<compile_context>
chip_gen: v5e
topology: v5e:2x2
jax: 0.10.0
libtpu: 0.0.40
codegen_flags: <defaults>
</compile_context>

<pallas_src>
import functools
import math

import jax
import jax.numpy as jnp
from jax.experimental import pallas as pl
from jax.experimental.pallas import tpu as pltpu


# ------------------------------ score kernels ------------------------------ #
# Each kernel sees encoder outputs as an (s_tile, B, H) tile (original torch
# layout, H on lanes) and writes one (s_tile, B) tile of raw attention energies.

def dot_score_kernel(u_ref, e_ref, o_ref):
    """score[s,b] = sum_h u[b,h] * e[s,b,h] (u = hidden, or hidden @ W for 'general')."""
    e = e_ref[...]                                   # (St, B, H) streamed dtype
    u = u_ref[...].astype(e.dtype)                   # (B, H) resident
    # Multiply in the streamed dtype (bf16 is native VALU on v6e/v7x),
    # accumulate the lane reduction in f32.
    o_ref[...] = jnp.sum((u[None, :, :] * e).astype(jnp.float32), axis=2)


def concat_score_kernel(hb_ref, e_ref, w2t_ref, v_ref, o_ref, *, act_dtype):
    """score[s,b] = sum_h v[h] * tanh(hb[b,h] + (e[s,b,:] @ W2^T)[h])."""
    B = e_ref.shape[1]
    w2t = w2t_ref[...]                               # (H, H) resident, compute_dtype
    v = v_ref[...]                                   # (1, H) f32 resident
    cols = []
    for b in range(B):                               # static unroll; B is small here
        e_b = e_ref[:, b, :]                         # (St, H) strided VMEM load
        g = jnp.dot(e_b.astype(w2t.dtype), w2t,
                    preferred_element_type=jnp.float32)          # (St, H) f32 acc
        pre = g + hb_ref[b:b + 1, :]                 # + hoisted h@W1^T + b  (1, H)
        energy = jnp.tanh(pre.astype(act_dtype)).astype(jnp.float32)
        cols.append(jnp.sum(v * energy, axis=1, keepdims=True))  # (St, 1)
    o_ref[...] = jnp.concatenate(cols, axis=1)       # (St, B)


# ------------------------------ softmax kernel ------------------------------ #

def softmax_sb_kernel(s_ref, o_ref):
    s = s_ref[...]                                   # (S, B) f32
    m = jnp.max(s, axis=0, keepdims=True)            # (1, B)
    p = jnp.exp(s - m)
    d = jnp.sum(p, axis=0, keepdims=True)
    # approx=False keeps the 1e-5 test tolerance; approx=True (EUP) when allowed.
    o_ref[...] = p * pl.reciprocal(d, approx=False)


# --------------------------------- helpers ---------------------------------- #

def _round_up(x, m):
    return ((x + m - 1) // m) * m


def _default_vmem_limit():
    """Generation-aware VMEM budget: ~75% of physical capacity."""
    try:
        cap = getattr(pltpu.get_tpu_info(), "vmem_capacity_bytes", None)
        if cap:
            return int(0.75 * cap)
    except Exception:
        pass
    return 48 << 20  # safe fallback on every generation (v7x has 64 MiB / TC)


# --------------------------------- wrapper ----------------------------------- #

class AttnPallas:
    """Pallas mirror of the PyTorch Attn module (forward pass only)."""

    def __init__(self, method, hidden_size, key,
                 compute_dtype=jnp.float32, max_s_tile=512):
        if method not in ("dot", "general", "concat"):
            raise ValueError(method, "is not an appropriate attention method.")
        self.method = method
        self.hidden_size = hidden_size
        self.compute_dtype = compute_dtype   # bf16 -> bf16 weights + bf16 tanh
        self.act_dtype = compute_dtype       # tanh dtype (bf16 EUP on v6e/v7x)
        self.max_s_tile = max_s_tile
        self.vmem_limit = _default_vmem_limit()
        H = hidden_size
        if method == "general":
            bound = 1.0 / math.sqrt(H)
            kw, kb = jax.random.split(key)
            self.W = jax.random.uniform(kw, (H, H), jnp.float32, -bound, bound)
            self.b = jax.random.uniform(kb, (1, H), jnp.float32, -bound, bound)
        elif method == "concat":
            bound = 1.0 / math.sqrt(2 * H)
            kw, kb, kv = jax.random.split(key, 3)
            self.W = jax.random.uniform(kw, (H, 2 * H), jnp.float32, -bound, bound)
            self.b = jax.random.uniform(kb, (1, H), jnp.float32, -bound, bound)
            # torch leaves v uninitialized; use a deterministic uniform init here.
            self.v = jax.random.uniform(kv, (1, H), jnp.float32, -1.0, 1.0)
            # Hoisted once: W1/W2 split + transposes (torch Linear uses x @ W^T).
            self.W1t = jnp.asarray(self.W[:, :H].T, jnp.float32)       # wrapper use
            self.W2t = jnp.asarray(self.W[:, H:].T, compute_dtype)     # kernel use

    # ------------------------- tiling / VMEM budget ------------------------- #
    def _vmem_estimate(self, s_tile, B, H, e_itemsize):
        n = 2 * s_tile * B * H * e_itemsize          # streamed e, double-buffered
        n += 2 * s_tile * B * 4                      # score tiles (f32)
        n += 2 * B * H * 4                           # resident u / hb
        if self.method == "concat":
            w_itemsize = jnp.dtype(self.compute_dtype).itemsize
            n += 2 * H * H * w_itemsize              # resident W2^T (2 bufs/spec)
            n += 2 * H * 4                           # v
            n += 3 * s_tile * H * 4                  # f32 matmul/tanh intermediates
        return n

    def _choose_s_tile(self, S, B, H, e_itemsize):
        if S <= 8:
            return S                                 # cannot split below 8 sublanes
        # Aim for >= 2 tiles so the "parallel" S axis can shard across v7x's two
        # TensorCores and the e-stream DMA overlaps compute.
        t = min(self.max_s_tile, _round_up(-(-S // 2), 8))
        t = max(8, (t // 8) * 8)
        # Shrink until the double-buffered working set leaves VMEM headroom.
        while t > 8 and self._vmem_estimate(t, B, H, e_itemsize) > self.vmem_limit // 2:
            t = max(8, ((t // 2) // 8) * 8)
        return t

    # ------------------- gridded score pass (all HBM traffic) --------------- #
    def _scores(self, kernel, args, s_tile, n_tiles, S, B, H):
        e_spec = pl.BlockSpec((s_tile, B, H), lambda k: (k, 0, 0))   # streamed
        bh_spec = pl.BlockSpec((B, H), lambda k: (0, 0))             # resident
        out_spec = pl.BlockSpec((s_tile, B), lambda k: (k, 0))

        if self.method in ("dot", "general"):
            in_specs = [bh_spec, e_spec]
        else:  # concat
            in_specs = [bh_spec, e_spec,
                        pl.BlockSpec((H, H), lambda k: (0, 0)),      # W2^T resident
                        pl.BlockSpec((1, H), lambda k: (0, 0))]      # v resident

        return pl.pallas_call(
            kernel,
            out_shape=jax.ShapeDtypeStruct((S, B), jnp.float32),
            grid_spec=pltpu.PrefetchScalarGridSpec(
                num_scalar_prefetch=0,
                grid=(n_tiles,),
                in_specs=in_specs,
                out_specs=out_spec),
            compiler_params=pltpu.CompilerParams(
                dimension_semantics=("parallel",),   # independent tiles -> megacore
                vmem_limit_bytes=int(self.vmem_limit)),
        )(*args)

    # --------------------------- tiny softmax pass --------------------------- #
    def _softmax_sb(self, scores):
        S, B = scores.shape
        if scores.size * 4 > self.vmem_limit // 4:
            # TODO(synk): tile the softmax over S (two-pass) for very long sequences.
            return jax.nn.softmax(scores, axis=0)
        vmem = pl.BlockSpec(memory_space=pltpu.MemorySpace.VMEM)
        return pl.pallas_call(
            softmax_sb_kernel,
            out_shape=jax.ShapeDtypeStruct((S, B), jnp.float32),
            in_specs=[vmem],
            out_specs=vmem,
        )(scores)

    # --------------------------------- call ---------------------------------- #
    def __call__(self, hidden, encoder_outputs):
        # hidden: (1, B, H);  encoder_outputs: (S, B, H)   (torch layout, untouched)
        h = hidden[0].astype(jnp.float32)                       # (B, H)
        e = encoder_outputs                                     # streamed as-is
        S, B, H = e.shape
        s_tile = self._choose_s_tile(S, B, H, jnp.dtype(e.dtype).itemsize)
        n_tiles = pl.cdiv(S, s_tile)
        hi = jax.lax.Precision.HIGHEST

        if self.method == "dot":
            scores = self._scores(dot_score_kernel, (h, e), s_tile, n_tiles, S, B, H)
        elif self.method == "general":
            # sum_h hidden*(e@W^T + b) == sum_j (hidden@W)_j * e_j + hidden.b
            u = jnp.dot(h, self.W, precision=hi)                # (B, H) hoisted
            scores = self._scores(dot_score_kernel, (u, e), s_tile, n_tiles, S, B, H)
            c = jnp.sum(h * self.b, axis=1)                     # (B,) softmax-invariant
            scores = scores + c[None, :]
        else:  # concat
            hb = jnp.dot(h, self.W1t, precision=hi) + self.b    # (B, H) hoisted
            kern = functools.partial(concat_score_kernel, act_dtype=self.act_dtype)
            scores = self._scores(kern, (hb, e, self.W2t, self.v),
                                  s_tile, n_tiles, S, B, H)

        attn_sb = self._softmax_sb(scores)                      # (S, B)
        # Orientation fix on the tiny attention weights only (cheap XLA op).
        return jnp.swapaxes(attn_sb, 0, 1)[:, None, :]          # (B, 1, S)

    # pure-JAX reference (mirrors the torch forward) for verification
    def reference(self, hidden, encoder_outputs):
        h = hidden  # (1, B, H) broadcasts over S
        hi = jax.lax.Precision.HIGHEST
        if self.method == "dot":
            energies = jnp.sum(h * encoder_outputs, axis=2)
        elif self.method == "general":
            energy = jnp.einsum("sbh,kh->sbk", encoder_outputs, self.W,
                                precision=hi) + self.b[0]
            energies = jnp.sum(h * energy, axis=2)
        else:
            cat = jnp.concatenate(
                [jnp.broadcast_to(h, encoder_outputs.shape), encoder_outputs], axis=2)
            energy = jnp.tanh(jnp.einsum("sbc,hc->sbh", cat, self.W,
                                         precision=hi) + self.b[0])
            energies = jnp.sum(self.v[0] * energy, axis=2)
        energies = energies.T                                   # (B, S)
        return jax.nn.softmax(energies, axis=1)[:, None, :]


if __name__ == "__main__":
    def check(method, S, B, H, key, atol=1e-5, rtol=1e-5):
        k_h, k_e, k_p = jax.random.split(key, 3)
        hidden = jax.random.normal(k_h, (1, B, H), jnp.float32)
        enc = jax.random.normal(k_e, (S, B, H), jnp.float32)
        attn = AttnPallas(method, H, k_p)
        out = jax.block_until_ready(attn(hidden, enc))
        ref = attn.reference(hidden, enc)
        assert out.shape == (B, 1, S), (method, out.shape)
        return bool(jnp.allclose(out, ref, atol=atol, rtol=rtol))

    keys = jax.random.split(jax.random.PRNGKey(0), 6)
    ok = True

    # small shapes implied by the module: seq=8, batch=2, hidden=32 (single tile)
    for i, method in enumerate(("dot", "general", "concat")):
        if not check(method, 8, 2, 32, keys[i]):
            ok = False
            print(f"MISMATCH method={method} (single-tile)")

    # exercise the tiled "parallel" grid path: seq=256 -> two 128-row S tiles
    for i, method in enumerate(("dot", "general", "concat")):
        if not check(method, 256, 2, 32, keys[3 + i], atol=1e-4, rtol=1e-4):
            ok = False
            print(f"MISMATCH method={method} (tiled)")

    if ok:
        print("KERNEL_OK")
</pallas_src>

<mosaic_0001>
module attributes {stable_mosaic.version = 11 : i64} {
  func.func @dot_score_kernel(%arg0: i32, %arg1: memref<2x32xf32, #tpu.memory_space<vmem>>, %arg2: memref<8x2x32xf32, #tpu.memory_space<vmem>>, %arg3: memref<8x2xf32, #tpu.memory_space<vmem>>) attributes {dimension_semantics = [#tpu.dimension_semantics<parallel>], iteration_bounds = array<i64: 1>, scalar_prefetch = 0 : i64, scratch_operands = 0 : i64, tpu.core_type = #tpu.core_type<tc>, window_params = [{pipeline_mode = #tpu.pipeline_mode<synchronous>, transform_indices = @transform_0, window_bounds = array<i64: 2, 32>}, {transform_indices = @transform_1, window_bounds = array<i64: 8, 2, 32>}, {transform_indices = @transform_2, window_bounds = array<i64: 8, 2>}]} {
    %c0 = arith.constant 0 : index
    %c0_0 = arith.constant 0 : index
    %c0_1 = arith.constant 0 : index
    %0 = vector.load %arg2[%c0, %c0_0, %c0_1] : memref<8x2x32xf32, #tpu.memory_space<vmem>>, vector<8x2x32xf32>
    %c0_2 = arith.constant 0 : index
    %c0_3 = arith.constant 0 : index
    %1 = vector.load %arg1[%c0_2, %c0_3] : memref<2x32xf32, #tpu.memory_space<vmem>>, vector<2x32xf32>
    %2 = vector.shape_cast %1 : vector<2x32xf32> to vector<1x2x32xf32>
    %3 = vector.broadcast %2 : vector<1x2x32xf32> to vector<8x2x32xf32>
    %4 = arith.mulf %3, %0 : vector<8x2x32xf32>
    %cst = arith.constant dense<0.000000e+00> : vector<8x2xf32>
    %5 = vector.multi_reduction <add>, %4, %cst [2] : vector<8x2x32xf32> to vector<8x2xf32>
    %c0_4 = arith.constant 0 : index
    %c0_5 = arith.constant 0 : index
    %6 = vector.load %arg3[%c0_4, %c0_5] : memref<8x2xf32, #tpu.memory_space<vmem>>, vector<8x2xf32>
    tpu.vector_store %arg3[%c0_4, %c0_5], %5 {strides = array<i32>} : memref<8x2xf32, #tpu.memory_space<vmem>>, vector<8x2xf32>,
    return
  }
  func.func @transform_0(%arg0: i32) -> (i32, i32) {
    %c0_i32 = arith.constant 0 : i32
    %c0_i32_0 = arith.constant 0 : i32
    %c0_i32_1 = arith.constant 0 : i32
    return %c0_i32, %c0_i32_0 : i32, i32
  }
  func.func @transform_1(%arg0: i32) -> (i32, i32, i32) {
    %c0_i32 = arith.constant 0 : i32
    %c0_i32_0 = arith.constant 0 : i32
    %c0_i32_1 = arith.constant 0 : i32
    return %arg0, %c0_i32, %c0_i32_0 : i32, i32, i32
  }
  func.func @transform_2(%arg0: i32) -> (i32, i32) {
    %c0_i32 = arith.constant 0 : i32
    %c0_i32_0 = arith.constant 0 : i32
    return %arg0, %c0_i32 : i32, i32
  }
}

</mosaic_0001>

<bundles_post_ra>
// kernel: tpu_custom_call.1
= control target key start
LH: loop header
LB: loop body
LE: loop exit
PB: predicated region body
PF: predicated region fallthrough
CT: control target
= control target key end

     0   :  { %7 = vsyncpa [#allocation3], 0  ;;  %s216_s0 = inlined_call_operand.hbm [shape: f32[2,32], index: 0, kind: input, shape index: {}]   ;;  %s217_s1 = inlined_call_operand.hbm [shape: f32[8,2,32], index: 1, kind: input, shape index: {}]   ;;  %s218_s2 = inlined_call_operand.vmem [shape: f32[8,2], index: 2, kind: output, shape index: {}]  }
   0x1   :  { %s14_s11 = sshll.u32 %s216_s0, 4  ;;  %s15_s11 = int_to_ptr.hbm [resolvable:$true] %s14_s11 }
   0x2   :  { %8 = vsyncpa [#allocation5], 0  ;;  %s180_s12 = smov [#allocation2]   ;;  %s24_s16 = sshll.u32 %s217_s1, 4  ;;  %s25_s16 = int_to_ptr.hbm [resolvable:$true] %s24_s16 }
   0x3   :  { %s16_s13 = sshll.u32 %s180_s12, 4  ;;  %s181_s17 = smov [#allocation4]   ;;  %s17_s13 = int_to_ptr.vmem [resolvable:$true] %s16_s13 }
   0x4   :  { %19 = dma.hbm_to_vmem [thread:$0]  %s15_s11, 32, %s17_s13, [#allocation3]  }
   0x5   :  { %s26_s18 = sshll.u32 %s181_s17, 4  ;;  %s182_s19 = smov 32   ;;  %s27_s18 = int_to_ptr.vmem [resolvable:$true] %s26_s18 }
   0x6   :  { %s183_s20 = smov 2  }
   0x7   :  { %32 = dma.hbm_to_vmem [thread:$0]  %s25_s16, 256, %s27_s18, [#allocation5], %s182_s19, %s182_s19, %s183_s20  }
   0x8   :  { %176 = dma.done.wait [#allocation3], 32  }
   0x9   :  { %177 = vsyncadd [#allocation3], 4294967264 }
   0xa   :  { %178 = dma.done.wait [#allocation5], 256  }
   0xb   :  { %179 = vsyncadd [#allocation5], 4294967040  ;;  %vm58_vm0 = vcmask 254976   ;;  %v41_v0 = vld [vmem:[#allocation4] sm:$0x3]  ;;  %v91_v27 = vlaneseq  ;;  %vm101_vm1 = vcmask 1041409  }
   0xc   :  { %v49_v1 = vld [vmem:[#allocation2] sm:$0x3]  ;;  %v43_v2 = vld [vmem:[#allocation4 + $0x4] sm:$0x3]  ;;  %v45_v5 = vld [vmem:[#allocation4 + $0x8] sm:$0x3] }
   0xd   :  { %v50_v3 = vmul.f32 %v49_v1, %v41_v0  ;;  %v52_v4 = vmul.f32 %v49_v1, %v43_v2  ;;  %v54_v6 = vmul.f32 %v49_v1, %v45_v5  ;;  %v42_v7 = vld [vmem:[#allocation4 + $0x2] sm:$0x3]  ;;  %v44_v8 = vld [vmem:[#allocation4 + $0x6] sm:$0x3]  ;;  %v46_v11 = vld [vmem:[#allocation4 + $0xa] sm:$0x3] }
   0xe   :  { %v51_v13 = vmul.f32 %v49_v1, %v42_v7  ;;  %v53_v14 = vmul.f32 %v49_v1, %v44_v8  ;;  %v55_v15 = vmul.f32 %v49_v1, %v46_v11  ;;  %v47_v19 = vld [vmem:[#allocation4 + $0xc] sm:$0x3]  ;;  %v48_v20 = vld [vmem:[#allocation4 + $0xe] sm:$0x3]  ;;  %v92_v29 = vand.u32 127, %v91_v27 }
   0xf   :  { %v59_v9 = vsel %vm58_vm0, %v50_v3, 0.0  ;;  %v65_v10 = vsel %vm58_vm0, %v52_v4, 0.0  ;;  %v71_v12 = vsel %vm58_vm0, %v54_v6, 0.0  ;;  %v56_v21 = vmul.f32 %v49_v1, %v47_v19 }
  0x10   :  { %60 = vadd.xlane.f32.xlu0 %v59_v9  ;;  %66 = vadd.xlane.f32.xlu1 %v65_v10  ;;  %v62_v16 = vsel %vm58_vm0, %v51_v13, 0.0  ;;  %v68_v17 = vsel %vm58_vm0, %v53_v14, 0.0  ;;  %v74_v18 = vsel %vm58_vm0, %v55_v15, 0.0  ;;  %v57_v22 = vmul.f32 %v49_v1, %v48_v20 }
  0x11   :  { %72 = vadd.xlane.f32.xlu2 %v71_v12  ;;  %v77_v23 = vsel %vm58_vm0, %v56_v21, 0.0  ;;  %vm103_vm2 = vcmask 1042434   ;;  %vm105_vm3 = vcmask 1043459   ;;  %vm107_vm4 = vcmask 1044484  }
  0x12   :  { %v80_v24 = vsel %vm58_vm0, %v57_v22, 0.0  ;;  %vm109_vm5 = vcmask 1045509   ;;  %vm111_vm6 = vcmask 1046534   ;;  %vm113_vm7 = vcmask 1047559  }
  0x13   :  { %vm116_vm8 = vcmask 15360  }
  0x18   :  { %63 = vadd.xlane.f32.xlu0 %v62_v16  ;;  %69 = vadd.xlane.f32.xlu1 %v68_v17 }
  0x19   :  { %75 = vadd.xlane.f32.xlu2 %v74_v18 }
  0x20   :  { %78 = vadd.xlane.f32.xlu0 %v77_v23  ;;  %81 = vadd.xlane.f32.xlu1 %v80_v24 }
  0x83   :  { %v61_v25 = vpop.xlane.xlu0 %60  ;;  %v67_v26 = vpop.xlane.xlu1 %66 }
  0x84   :  { %v73_v28 = vpop.xlane.xlu2 %72  ;;  %v93_v32 = vperm.slane %v61_v25, %v92_v29  ;;  %v95_v35 = vperm.slane %v67_v26, %v92_v29 }
  0x85   :  { %v97_v39 = vperm.slane %v73_v28, %v92_v29 }
  0x8b   :  { %v64_v30 = vpop.xlane.xlu0 %63  ;;  %v70_v31 = vpop.xlane.xlu1 %69 }
  0x8c   :  { %v94_v33 = vperm.slane %v64_v30, %v92_v29  ;;  %v96_v34 = vperm.slane %v70_v31, %v92_v29  ;;  %v76_v37 = vpop.xlane.xlu2 %75 }
  0x8d   :  { %v98_v41 = vperm.slane %v76_v37, %v92_v29 }
  0x8e   :  { %v102_v36 = vsel %vm101_vm1, %v94_v33, %v93_v32 }
  0x8f   :  { %v104_v38 = vsel %vm103_vm2, %v95_v35, %v102_v36 }
  0x90   :  { %v106_v40 = vsel %vm105_vm3, %v96_v34, %v104_v38 }
  0x91   :  { %v108_v42 = vsel %vm107_vm4, %v97_v39, %v106_v40 }
  0x92   :  { %v110_v47 = vsel %vm109_vm5, %v98_v41, %v108_v42 }
  0x93   :  { %v79_v43 = vpop.xlane.xlu0 %78  ;;  %v82_v44 = vpop.xlane.xlu1 %81 }
  0x94   :  { %v99_v45 = vperm.slane %v79_v43, %v92_v29  ;;  %v100_v46 = vperm.slane %v82_v44, %v92_v29 }
  0x96   :  { %v112_v48 = vsel %vm111_vm6, %v99_v45, %v110_v47 }
  0x97   :  { %v114_v49 = vsel %vm113_vm7, %v100_v46, %v112_v48 }
  0x98   :  { %117 = vst.msk [vmem:[%s218_s2] sm:$0xff] %vm116_vm8, %v114_v49 }
  0x99   :  { %122 = vsyncpa [#allocation3], 1 }
  0x9a   :  { %123 = vsyncpa [#allocation5], 1 }

</bundles_post_ra>
